<compile_context>
chip_gen: v6e
topology: v6e:2x2x1
jax: 0.10.0
libtpu: 0.0.40
codegen_flags: <defaults>
</compile_context>

<pallas_src>
import math

import numpy as np
import jax
import jax.numpy as jnp
from jax.experimental import pallas as pl
from jax.experimental.pallas import tpu as pltpu


# ----------------------------- small helpers --------------------------------

def _round_up(x, m):
    return ((x + m - 1) // m) * m


def _pick_div_tile(dim, target, align):
    """Largest tile <= min(target, dim) that is a multiple of `align` and divides
    `dim`; falls back to the full dim (always legal for a BlockSpec)."""
    t = (min(target, dim) // align) * align
    while t >= align:
        if dim % t == 0:
            return t
        t -= align
    return dim


# --------------------------- tiled matmul kernel -----------------------------

def _matmul_kernel(x_ref, w_ref, o_ref, acc_ref):
    @pl.when(pl.program_id(2) == 0)
    def _init():
        acc_ref[...] = jnp.zeros_like(acc_ref)

    acc_ref[...] += jnp.dot(x_ref[...], w_ref[...],
                            preferred_element_type=jnp.float32)

    @pl.when(pl.program_id(2) == pl.num_programs(2) - 1)
    def _store():
        o_ref[...] = acc_ref[...].astype(o_ref.dtype)


def matmul(x, w, out_dtype=jnp.float32):
    """y = x @ w with bf16 MXU inputs, f32 accumulation, `out_dtype` store.

    x: (M, K) bf16, w: (K, N) bf16 (pre-transposed nn.Linear weight).
    Rows are zero-padded up to an MXU/packing-aligned row tile instead of
    shrinking the tile; tn/tk prefer 128-multiples.  Tile budget (~2 MiB with
    double buffering) fits v5e/v6e (128 MiB VMEM) and v7x (64 MiB) alike.
    """
    M, K = x.shape
    K2, N = w.shape
    assert K == K2
    tm = min(256, _round_up(M, 16))          # bf16 sublane packing is 16
    Mp = _round_up(M, tm)
    if Mp != M:
        x = jnp.pad(x, ((0, Mp - M), (0, 0)))
    tn = _pick_div_tile(N, 256, 128)
    tk = _pick_div_tile(K, 512, 128)
    grid = (Mp // tm, N // tn, K // tk)
    out = pl.pallas_call(
        _matmul_kernel,
        out_shape=jax.ShapeDtypeStruct((Mp, N), out_dtype),
        grid_spec=pltpu.PrefetchScalarGridSpec(
            num_scalar_prefetch=0,
            grid=grid,
            in_specs=[
                pl.BlockSpec((tm, tk), lambda i, j, kk: (i, kk)),
                pl.BlockSpec((tk, tn), lambda i, j, kk: (kk, j)),
            ],
            out_specs=pl.BlockSpec((tm, tn), lambda i, j, kk: (i, j)),
            scratch_shapes=[pltpu.VMEM((tm, tn), jnp.float32)],
        ),
        compiler_params=pltpu.CompilerParams(
            dimension_semantics=("parallel", "parallel", "arbitrary"),
            vmem_limit_bytes=64 * 1024 * 1024),
    )(x, w)
    return out[:M] if Mp != M else out


# ----------------------- GQA flash attention kernel ---------------------------

def _flash_attn_kernel(kv_hi_ref, pos_ref, q_ref, k_ref, v_ref, o_ref,
                       m_ref, l_ref, acc_ref):
    # kv_hi_ref: (n_q_tiles,) int32 SMEM - last KV block each q-row tile needs.
    # pos_ref:   (tq, 1) int32 - query position of every row in this tile.
    # q_ref:     (1, tq, D) bf16 (softmax scale pre-folded into q).
    # k/v_ref:   (1, tkv, D) bf16 (one compact KV head per group).
    # o_ref:     (1, tq, D) bf16.
    # scratch:   m/l (tq, 1) f32, acc (tq, D) f32.
    qi = pl.program_id(1)
    ki = pl.program_id(2)
    tkv = k_ref.shape[1]
    kv0 = ki * tkv

    @pl.when(ki == 0)
    def _init():
        m_ref[...] = jnp.full_like(m_ref, -jnp.inf)
        l_ref[...] = jnp.zeros_like(l_ref)
        acc_ref[...] = jnp.zeros_like(acc_ref)

    @pl.when(ki <= kv_hi_ref[qi])   # skip KV tiles entirely above the causal diagonal
    def _compute():
        q = q_ref[0]                # (tq, D)
        k = k_ref[0]                # (tkv, D)
        v = v_ref[0]
        # ONE fused matmul over all rep grouped heads x query rows in the tile.
        s = jax.lax.dot_general(q, k, (((1,), (1,)), ((), ())),
                                preferred_element_type=jnp.float32)   # (tq, tkv)
        # Causal mask (top-left aligned, matching torch SDPA is_causal=True).
        # -1e30 instead of -inf keeps fully-masked rows NaN-free.
        col = kv0 + jax.lax.broadcasted_iota(jnp.int32, s.shape, 1)
        s = jnp.where(col <= pos_ref[...], s, -1e30)
        # TODO(synk): drop the jnp.where on KV tiles strictly below the diagonal.
        m_prev = m_ref[...]
        m_new = jnp.maximum(m_prev, jnp.max(s, axis=-1, keepdims=True))
        alpha = jnp.exp(m_prev - m_new)
        p = jnp.exp(s - m_new)
        l_ref[...] = alpha * l_ref[...] + jnp.sum(p, axis=-1, keepdims=True)
        acc_ref[...] = alpha * acc_ref[...] + jnp.dot(
            p.astype(v.dtype), v, preferred_element_type=jnp.float32)
        m_ref[...] = m_new

    @pl.when(ki == pl.num_programs(2) - 1)
    def _store():
        inv_l = pl.reciprocal(l_ref[...], approx=True)
        o_ref[0] = (acc_ref[...] * inv_l).astype(o_ref.dtype)


def flash_attention(q_rows, k, v, *, rep, seq_q):
    """Causal GQA flash attention over row-collapsed queries.

    q_rows: (G, R, D) bf16, R = seq_q * rep, row = position*rep + head_in_group
            (softmax scale already folded into q).
    k, v:   (G, S_kv, D) bf16 - one compact KV head per group.
    Returns (G, R, D) bf16.
    """
    G, R, D = q_rows.shape
    S_kv = k.shape[1]
    assert R == seq_q * rep

    # Query-row tile: 16-aligned (bf16 packing), target 256 rows.
    tq = min(256, _round_up(R, 16))
    Rp = _round_up(R, tq)
    # KV tile: 128-aligned target 512; padded KV columns are always masked by
    # the causal mask because every query position < S_kv.
    kv_align = 128 if S_kv >= 128 else 16
    tkv = min(512, _round_up(S_kv, kv_align))
    S_kvp = _round_up(S_kv, tkv)

    if Rp != R:
        q_rows = jnp.pad(q_rows, ((0, 0), (0, Rp - R), (0, 0)))
    if S_kvp != S_kv:
        k = jnp.pad(k, ((0, 0), (0, S_kvp - S_kv), (0, 0)))
        v = jnp.pad(v, ((0, 0), (0, S_kvp - S_kv), (0, 0)))

    # Query position of each (padded) row; positions are nondecreasing in row.
    positions = jnp.repeat(jnp.arange(seq_q, dtype=jnp.int32), rep)
    positions = jnp.pad(positions, (0, Rp - R), constant_values=seq_q - 1)
    positions = positions[:, None]                                     # (Rp, 1)

    # Last KV block each q-row tile needs (static shapes -> plain numpy).
    n_q = Rp // tq
    n_kv = S_kvp // tkv
    q_hi = np.minimum((np.arange(n_q) * tq + (tq - 1)) // rep, seq_q - 1)
    kv_hi_blk = jnp.asarray(np.minimum(q_hi // tkv, n_kv - 1), dtype=jnp.int32)

    def q_map(g, qi, ki, kv_hi):
        return (g, qi, 0)

    def kv_map(g, qi, ki, kv_hi):
        # Clamp to the last needed block: fully-masked KV tiles reuse the
        # previous block index so their HBM->VMEM DMA is skipped entirely.
        return (g, jnp.minimum(ki, kv_hi[qi]), 0)

    def pos_map(g, qi, ki, kv_hi):
        return (qi, 0)

    out = pl.pallas_call(
        _flash_attn_kernel,
        out_shape=jax.ShapeDtypeStruct((G, Rp, D), jnp.bfloat16),
        grid_spec=pltpu.PrefetchScalarGridSpec(
            num_scalar_prefetch=1,
            grid=(G, n_q, n_kv),
            in_specs=[
                pl.BlockSpec((tq, 1), pos_map),
                pl.BlockSpec((1, tq, D), q_map),
                pl.BlockSpec((1, tkv, D), kv_map),
                pl.BlockSpec((1, tkv, D), kv_map),
            ],
            out_specs=pl.BlockSpec((1, tq, D), q_map),
            scratch_shapes=[
                pltpu.VMEM((tq, 1), jnp.float32),   # running max
                pltpu.VMEM((tq, 1), jnp.float32),   # running denom
                pltpu.VMEM((tq, D), jnp.float32),   # running numerator
            ],
        ),
        compiler_params=pltpu.CompilerParams(
            dimension_semantics=("parallel", "parallel", "arbitrary"),
            vmem_limit_bytes=64 * 1024 * 1024),
    )(kv_hi_blk, positions, q_rows, k, v)
    return out[:, :R] if Rp != R else out


# ------------------------------- JAX glue -----------------------------------

def apply_rotary_emb(q, k, freqs_cis, layer_index, rope_scaling, q_scale=1.0):
    """Matches the PyTorch apply_rotary_emb (interleaved real/imag pairs).

    The reference multiplies the complex freqs by a *real* factor (scales magnitude
    as well as phase); reproduced exactly.  `q_scale` folds the softmax 1/sqrt(D)
    scale into q's rotation for free.
    """
    factor = (rope_scaling['high_freq_factor'] if layer_index >= 16
              else rope_scaling['low_freq_factor'])
    S = q.shape[-2]
    D = q.shape[-1]
    fc = freqs_cis[:S, :D // 2] * factor                  # complex (S, D/2)
    cos = jnp.real(fc).astype(jnp.float32)[None, None]    # (1, 1, S, D/2)
    sin = jnp.imag(fc).astype(jnp.float32)[None, None]

    def rot(x, c, s):
        x = x.astype(jnp.float32)
        xp = x.reshape(x.shape[:-1] + (D // 2, 2))
        xr = xp[..., 0]
        xi = xp[..., 1]
        yr = xr * c - xi * s
        yi = xr * s + xi * c
        return jnp.stack([yr, yi], axis=-1).reshape(x.shape)

    q_rot = rot(q, cos * q_scale, sin * q_scale)
    k_rot = rot(k, cos, sin)
    return q_rot, k_rot


class CustomAttentionLayerPallas:
    """JAX/Pallas port of CustomAttentionLayer (weights generated in-script)."""

    def __init__(self, hidden_size, num_heads, num_key_value_heads, head_dim,
                 layer_index, rope_scaling, key):
        self.hidden_size = hidden_size
        self.num_heads = num_heads
        self.num_key_value_heads = num_key_value_heads
        self.head_dim = head_dim
        self.layer_index = layer_index
        self.rope_scaling = rope_scaling
        self.scale = 1.0 / math.sqrt(head_dim)
        self.kv_dim = num_key_value_heads * head_dim

        kq, kk, kv, ko = jax.random.split(key, 4)
        # nn.Linear weight convention: (out_features, in_features)
        q_w = 0.02 * jax.random.normal(kq, (hidden_size, hidden_size), jnp.float32)
        k_w = 0.02 * jax.random.normal(kk, (self.kv_dim, hidden_size), jnp.float32)
        v_w = 0.02 * jax.random.normal(kv, (self.kv_dim, hidden_size), jnp.float32)
        o_w = 0.02 * jax.random.normal(ko, (hidden_size, hidden_size), jnp.float32)
        self.q_w, self.k_w, self.v_w, self.o_w = q_w, k_w, v_w, o_w   # f32 (reference)
        # Fuse q/k/v along the output dim, pre-transpose ONCE to (in, out) and cast
        # to bf16 so the kernel never re-transposes / re-casts weights per call.
        self.w_qkv_t = jnp.concatenate([q_w, k_w, v_w], axis=0).T.astype(jnp.bfloat16)
        self.o_w_t = o_w.T.astype(jnp.bfloat16)

    def __call__(self, hidden_states, freqs_cis, past_key_value=None,
                 position_ids=None):
        B, S, _ = hidden_states.shape
        H, KVH, D = self.num_heads, self.num_key_value_heads, self.head_dim
        rep = H // KVH
        hid = self.hidden_size
        kvd = self.kv_dim

        # Fused QKV projection; bf16 output halves HBM writeback (f32 accumulation
        # stays in-kernel; RoPE upcasts to f32 per element anyway).
        x2d = hidden_states.reshape(B * S, hid).astype(jnp.bfloat16)
        qkv = matmul(x2d, self.w_qkv_t, out_dtype=jnp.bfloat16)       # (B*S, hid+2*kvd)

        q = qkv[:, :hid].reshape(B, S, H, D).transpose(0, 2, 1, 3)          # (B,H,S,D)
        k = qkv[:, hid:hid + kvd].reshape(B, S, KVH, D).transpose(0, 2, 1, 3)
        v = qkv[:, hid + kvd:].reshape(B, S, KVH, D).transpose(0, 2, 1, 3)

        # RoPE on compact KV heads (replication commutes with per-head RoPE);
        # softmax scale folded into q's rotation (zero extra ops).
        q_rot, k_rot = apply_rotary_emb(q, k, freqs_cis, self.layer_index,
                                        self.rope_scaling, q_scale=self.scale)

        # Returned cache matches the reference layout (replicated to H heads, f32).
        k_ret = jnp.repeat(k_rot, rep, axis=1)                              # (B,H,S,D)
        v_ret = jnp.repeat(v.astype(jnp.float32), rep, axis=1)

        has_cache = (past_key_value is not None
                     and past_key_value[0] is not None
                     and past_key_value[1] is not None)
        if has_cache:
            k_ret = jnp.concatenate([past_key_value[0], k_ret], axis=2)
            v_ret = jnp.concatenate([past_key_value[1], v_ret], axis=2)
            S_kv = k_ret.shape[2]
            # Cache layout is replicated per query head (reference contract), so the
            # kernel runs with group size 1 here.  The causal-skip DMA clamp still
            # avoids streaming the (never attended) tail of the cache.
            q_g = q_rot.reshape(B * H, S, D).astype(jnp.bfloat16)
            k_g = k_ret.reshape(B * H, S_kv, D).astype(jnp.bfloat16)
            v_g = v_ret.reshape(B * H, S_kv, D).astype(jnp.bfloat16)
            attn = flash_attention(q_g, k_g, v_g, rep=1, seq_q=S)           # (B*H,S,D)
            attn = attn.reshape(B, H, S, D).transpose(0, 2, 1, 3)           # (B,S,H,D)
        else:
            # GQA hot path: compact KV, all `rep` query heads of a group share one KV
            # stream; rows are (position, head-in-group) interleaved so the kernel runs
            # ONE big matmul per tile (no per-head loop, no jnp.repeat of K/V).
            q_g = (q_rot.reshape(B, KVH, rep, S, D)
                        .transpose(0, 1, 3, 2, 4)                           # (B,KVH,S,rep,D)
                        .reshape(B * KVH, S * rep, D).astype(jnp.bfloat16))
            k_g = k_rot.reshape(B * KVH, S, D).astype(jnp.bfloat16)
            v_g = v.reshape(B * KVH, S, D).astype(jnp.bfloat16)
            attn = flash_attention(q_g, k_g, v_g, rep=rep, seq_q=S)         # (G,S*rep,D)
            attn = (attn.reshape(B, KVH, S, rep, D)
                        .transpose(0, 2, 1, 3, 4))                          # (B,S,KVH,rep,D)

        attn2d = attn.reshape(B * S, hid)                                   # bf16
        out = matmul(attn2d, self.o_w_t, out_dtype=jnp.float32).reshape(B, S, hid)
        return out, (k_ret, v_ret)


def make_freqs_cis(max_seq, head_dim, theta=10000.0):
    inv_freq = 1.0 / (theta ** (jnp.arange(0, head_dim, 2, dtype=jnp.float32)
                                / head_dim))                  # (D/2,)
    t = jnp.arange(max_seq, dtype=jnp.float32)
    freqs = jnp.outer(t, inv_freq)                            # (max_seq, D/2)
    return jnp.exp(1j * freqs.astype(jnp.complex64))          # complex64


def reference_forward(layer, hidden_states, freqs_cis):
    """Pure-JAX f32 reference reproducing the PyTorch forward (no cache)."""
    B, S, _ = hidden_states.shape
    H, KVH, D = layer.num_heads, layer.num_key_value_heads, layer.head_dim
    rep = H // KVH
    q = hidden_states @ layer.q_w.T
    k = hidden_states @ layer.k_w.T
    v = hidden_states @ layer.v_w.T
    q = q.reshape(B, S, H, D).transpose(0, 2, 1, 3)
    k = k.reshape(B, S, KVH, D).transpose(0, 2, 1, 3)
    v = v.reshape(B, S, KVH, D).transpose(0, 2, 1, 3)
    k = jnp.repeat(k, rep, axis=1)
    v = jnp.repeat(v, rep, axis=1)
    q_rot, k_rot = apply_rotary_emb(q, k, freqs_cis, layer.layer_index,
                                    layer.rope_scaling)
    scores = jnp.einsum('bhsd,bhtd->bhst', q_rot, k_rot) / math.sqrt(D)
    mask = jnp.arange(S)[None, :] <= jnp.arange(S)[:, None]
    scores = jnp.where(mask[None, None], scores, -1e30)
    p = jax.nn.softmax(scores, axis=-1)
    attn = jnp.einsum('bhst,bhtd->bhsd', p, v)
    attn = attn.transpose(0, 2, 1, 3).reshape(B, S, H * D)
    return attn @ layer.o_w.T


if __name__ == "__main__":
    # Small Llama-like config consistent with the module's shape algebra.
    hidden_size = 64
    num_heads = 4
    num_key_value_heads = 2
    head_dim = 16          # num_heads * head_dim == hidden_size
    batch = 2
    seq = 8
    layer_index = 0
    rope_scaling = {"low_freq_factor": 1.0, "high_freq_factor": 4.0}

    key = jax.random.PRNGKey(0)
    k_w, k_x, k_x2 = jax.random.split(key, 3)

    layer = CustomAttentionLayerPallas(hidden_size, num_heads,
                                       num_key_value_heads, head_dim,
                                       layer_index, rope_scaling, k_w)

    hidden_states = jax.random.normal(k_x, (batch, seq, hidden_size), jnp.float32)
    freqs_cis = make_freqs_cis(max_seq=32, head_dim=head_dim)

    # Prefill (no cache) path.
    out, (k_cache, v_cache) = layer(hidden_states, freqs_cis)
    jax.block_until_ready(out)
    assert out.shape == (batch, seq, hidden_size)
    assert k_cache.shape == (batch, num_heads, seq, head_dim)
    assert v_cache.shape == (batch, num_heads, seq, head_dim)
    assert bool(jnp.all(jnp.isfinite(out)))

    ref = reference_forward(layer, hidden_states, freqs_cis)
    err = float(jnp.max(jnp.abs(out - ref)))
    assert err < 3e-2, f"max abs err vs f32 reference = {err}"

    # Exercise the past_key_value (cache) path too.
    hidden_states2 = jax.random.normal(k_x2, (batch, seq, hidden_size), jnp.float32)
    out2, (k_cache2, v_cache2) = layer(hidden_states2, freqs_cis,
                                       past_key_value=(k_cache, v_cache))
    jax.block_until_ready(out2)
    assert out2.shape == (batch, seq, hidden_size)
    assert k_cache2.shape == (batch, num_heads, 2 * seq, head_dim)
    assert v_cache2.shape == (batch, num_heads, 2 * seq, head_dim)
    assert bool(jnp.all(jnp.isfinite(out2)))

    print("KERNEL_OK")
</pallas_src>

<mosaic_0001>
module attributes {stable_mosaic.version = 11 : i64} {
  func.func @_matmul_kernel(%arg0: i32, %arg1: i32, %arg2: i32, %arg3: memref<16x64xbf16, #tpu.memory_space<vmem>>, %arg4: memref<64x128xbf16, #tpu.memory_space<vmem>>, %arg5: memref<16x128xbf16, #tpu.memory_space<vmem>>, %arg6: memref<16x128xf32, #tpu.memory_space<vmem>>) attributes {dimension_semantics = [#tpu.dimension_semantics<parallel>, #tpu.dimension_semantics<parallel>, #tpu.dimension_semantics<arbitrary>], iteration_bounds = array<i64: 1, 1, 1>, scalar_prefetch = 0 : i64, scratch_operands = 1 : i64, tpu.core_type = #tpu.core_type<tc>, window_params = [{transform_indices = @transform_0, window_bounds = array<i64: 16, 64>}, {transform_indices = @transform_1, window_bounds = array<i64: 64, 128>}, {transform_indices = @transform_2, window_bounds = array<i64: 16, 128>}]} {
    %c0_i32 = arith.constant 0 : i32
    %0 = arith.cmpi eq, %arg2, %c0_i32 : i32
    %1 = arith.extui %0 : i1 to i32
    %c0_i32_0 = arith.constant 0 : i32
    %2 = arith.cmpi ne, %1, %c0_i32_0 : i32
    scf.if %2 {
      %cst_10 = arith.constant 0.000000e+00 : f32
      %12 = vector.broadcast %cst_10 : f32 to vector<16x128xf32>
      %c0_11 = arith.constant 0 : index
      %c0_12 = arith.constant 0 : index
      %13 = vector.load %arg6[%c0_11, %c0_12] : memref<16x128xf32, #tpu.memory_space<vmem>>, vector<16x128xf32>
      tpu.vector_store %arg6[%c0_11, %c0_12], %12 {strides = array<i32>} : memref<16x128xf32, #tpu.memory_space<vmem>>, vector<16x128xf32>,
    } else {
    }
    %c0 = arith.constant 0 : index
    %c0_1 = arith.constant 0 : index
    %3 = vector.load %arg6[%c0, %c0_1] : memref<16x128xf32, #tpu.memory_space<vmem>>, vector<16x128xf32>
    %c0_2 = arith.constant 0 : index
    %c0_3 = arith.constant 0 : index
    %4 = vector.load %arg3[%c0_2, %c0_3] : memref<16x64xbf16, #tpu.memory_space<vmem>>, vector<16x64xbf16>
    %c0_4 = arith.constant 0 : index
    %c0_5 = arith.constant 0 : index
    %5 = vector.load %arg4[%c0_4, %c0_5] : memref<64x128xbf16, #tpu.memory_space<vmem>>, vector<64x128xbf16>
    %cst = arith.constant dense<0.000000e+00> : vector<16x128xf32>
    %6 = tpu.matmul %4, %5, %cst {dimension_numbers = #tpu.dot_dimension_numbers<[1], [0], [0], [1], [0, 0, 1, 1], [], []>} : vector<16x64xbf16>, vector<64x128xbf16>, vector<16x128xf32> -> vector<16x128xf32>
    %7 = arith.addf %3, %6 : vector<16x128xf32>
    %c0_6 = arith.constant 0 : index
    %c0_7 = arith.constant 0 : index
    %8 = vector.load %arg6[%c0_6, %c0_7] : memref<16x128xf32, #tpu.memory_space<vmem>>, vector<16x128xf32>
    tpu.vector_store %arg6[%c0_6, %c0_7], %7 {strides = array<i32>} : memref<16x128xf32, #tpu.memory_space<vmem>>, vector<16x128xf32>,
    %c0_i32_8 = arith.constant 0 : i32
    %9 = arith.cmpi eq, %arg2, %c0_i32_8 : i32
    %10 = arith.extui %9 : i1 to i32
    %c0_i32_9 = arith.constant 0 : i32
    %11 = arith.cmpi ne, %10, %c0_i32_9 : i32
    scf.if %11 {
      %c0_10 = arith.constant 0 : index
      %c0_11 = arith.constant 0 : index
      %12 = vector.load %arg6[%c0_10, %c0_11] : memref<16x128xf32, #tpu.memory_space<vmem>>, vector<16x128xf32>
      %13 = arith.truncf %12 : vector<16x128xf32> to vector<16x128xbf16>
      %c0_12 = arith.constant 0 : index
      %c0_13 = arith.constant 0 : index
      %14 = vector.load %arg5[%c0_12, %c0_13] : memref<16x128xbf16, #tpu.memory_space<vmem>>, vector<16x128xbf16>
      tpu.vector_store %arg5[%c0_12, %c0_13], %13 {strides = array<i32>} : memref<16x128xbf16, #tpu.memory_space<vmem>>, vector<16x128xbf16>,
    } else {
    }
    return
  }
  func.func @transform_0(%arg0: i32, %arg1: i32, %arg2: i32) -> (i32, i32) {
    %c0_i32 = arith.constant 0 : i32
    return %arg0, %arg2 : i32, i32
  }
  func.func @transform_1(%arg0: i32, %arg1: i32, %arg2: i32) -> (i32, i32) {
    %c0_i32 = arith.constant 0 : i32
    return %arg2, %arg1 : i32, i32
  }
  func.func @transform_2(%arg0: i32, %arg1: i32, %arg2: i32) -> (i32, i32) {
    %c0_i32 = arith.constant 0 : i32
    return %arg0, %arg1 : i32, i32
  }
}

</mosaic_0001>

<bundles_post_ra>
// kernel: tpu_custom_call.1
= control target key start
LH: loop header
LB: loop body
LE: loop exit
PB: predicated region body
PF: predicated region fallthrough
CT: control target
= control target key end

     0   :  { %7 = vsyncpa [#allocation4], 0  ;;  %s320_s0 = inlined_call_operand.hbm [shape: bf16[16,64], index: 0, kind: input, shape index: {}]   ;;  %s321_s1 = inlined_call_operand.hbm [shape: bf16[64,128], index: 1, kind: input, shape index: {}]   ;;  %s322_s2 = inlined_call_operand.hbm [shape: bf16[16,128], index: 2, kind: output, shape index: {}]  }
   0x1   :  { %8 = vsyncpa [#allocation7], 0 }
   0x2   :  { %9 = vsyncpa [#allocation5], 0  ;;  %s280_s9 = smov [#allocation3]  }
   0x3   :  { %s15_s10 = sshll.u32 %s280_s9, 4  ;;  %s16_s10 = int_to_ptr.vmem [resolvable:$true] %s15_s10 }
   0x4   :  { %s222_s11 = scalar_lea.vmem %s16_s10, 128  ;;  %p227_p1 = scmp.lt.s32.totalorder %s16_s10, %s16_s10 }
   0x5   :  { %p223_p0 = scmp.ne.s32.totalorder %s16_s10, %s222_s11  ;;  %p228_p2 = scmp.lt.s32.totalorder %s222_s11, %s222_s11 }
   0x7   :  { %p229_p3 = por %p228_p2, %p227_p1 }
   0x9   :  { %p230_p4 = pnand %p229_p3, %p223_p0 }
   0xb   :  { %233 = shalt.err (!%p230_p4)
}
   0xc   :  { %s281_s12 = smov 64   ;;  %s282_s13 = smov 4  }
   0xd   :  { %21 = dma.hbm_to_vmem [thread:$0]  %s320_s0, 128, %s16_s10, [#allocation4], %s281_s12, %s281_s12, %s282_s13  }
   0xe   :  { %s283_s16 = smov [#allocation6]  }
   0xf   :  { %s27_s17 = sshll.u32 %s283_s16, 4  ;;  %s28_s17 = int_to_ptr.vmem [resolvable:$true] %s27_s17 }
  0x10   :  { %s242_s18 = scalar_lea.vmem %s28_s17, 512  ;;  %p247_p6 = scmp.lt.s32.totalorder %s28_s17, %s28_s17 }
  0x11   :  { %p243_p5 = scmp.ne.s32.totalorder %s28_s17, %s242_s18  ;;  %p248_p7 = scmp.lt.s32.totalorder %s242_s18, %s242_s18 }
  0x13   :  { %p249_p8 = por %p248_p7, %p247_p6 }
  0x15   :  { %p250_p9 = pnand %p249_p8, %p243_p5 }
  0x17   :  { %253 = shalt.err (!%p250_p9)
}
  0x18   :  { %33 = dma.hbm_to_vmem [thread:$0]  %s321_s1, 512, %s28_s17, [#allocation7], %s281_s12, %s281_s12, %s282_s13  }
  0x19   :  { %274 = dma.done.wait [#allocation4], 128  }
  0x1a   :  { %275 = vsyncadd [#allocation4], 4294967168 }
  0x1b   :  { %276 = dma.done.wait [#allocation7], 512  }
  0x1c   :  { %277 = vsyncadd [#allocation7], 4294966784  ;;  %v284_v0 = vmov 0.0   ;;  %vm285_vm0 = vmmov 0   ;;  %v209_v1 = vld [vmem:[#allocation6 + $0x18] sm:$0xff]   ;;  %v210_v2 = vld [vmem:[#allocation6 + $0x10] sm:$0xff]  }
  0x1d   :  { %190 = vmatprep.subr.bf16.mxu0 %v284_v0  ;;  %198 = vmatprep.mubr.msk.bf16.mxu0 %vm285_vm0, %v284_v0  ;;  %v211_v3 = vld [vmem:[#allocation6 + $0x8] sm:$0xff]   ;;  %v212_v4 = vld [vmem:[#allocation6] sm:$0xff]   ;;  %v213_v5 = vld [vmem:[#allocation3] sm:$0xff]   ;;  %vm88_vm1 = vcmask 523264   ;;  %s286_s0 = smov [#allocation8]  }
  0x1e   :  { %191 = vmatpush3.bf16.msra.mxu0 %v209_v1  ;;  %s157_s1 = sshll.u32 %s286_s0, 4  ;;  %s158_s1 = int_to_ptr.vmem [resolvable:$true] %s157_s1 }
  0x1f   :  { %192 = vmatprep.subr.bf16.mxu0 %v284_v0  ;;  %s254_s21 = scalar_lea.vmem %s158_s1, 128  ;;  %p259_p11 = scmp.lt.s32.totalorder %s158_s1, %s158_s1 }
  0x20   :  { %p255_p10 = scmp.ne.s32.totalorder %s158_s1, %s254_s21  ;;  %p260_p12 = scmp.lt.s32.totalorder %s254_s21, %s254_s21 }
  0x22   :  { %193 = vmatpush3.bf16.msra.mxu0 %v210_v2  ;;  %p261_p13 = por %p260_p12, %p259_p11 }
  0x23   :  { %194 = vmatprep.subr.bf16.mxu0 %v284_v0 }
  0x24   :  { %p262_p0 = pnand %p261_p13, %p255_p10 }
  0x26   :  { %195 = vmatpush3.bf16.msra.mxu0 %v211_v3 }
  0x27   :  { %196 = vmatprep.subr.bf16.mxu0 %v284_v0 }
  0x2a   :  { %197 = vmatpush3.bf16.msra.mxu0 %v212_v4 }
  0x2d   :  { %199 = vmatmul.mubr.msk.bf16.vlgmr.msra.gmra.mxu0 %vm88_vm1, %v213_v5 }
  0xed   :  { %v126_v6 = vpop.f32.mrf.mxu0 }
  0xef   :  { %v200_v7 = vpop.f32.mrf.mxu0 }
  0xf1   :  { %v129_v8 = vpop.f32.mrf.mxu0 }
  0xf2   :  { %v183_v9 = vpack.c.bf16 %v129_v8, %v126_v6 }
  0xf3   :  { %v201_v10 = vpop.f32.mrf.mxu0 }
  0xf4   :  { %184 = vst [vmem:[#allocation8] sm:$0xff] %v183_v9  }
  0xf5   :  { %265 = shalt.err (!%p262_p0)
}
  0xf6   :  { %163 = dma.vmem_to_hbm [thread:$0]  %s158_s1, 128, %s322_s2, [#allocation5], %s281_s12, %s281_s12, %s282_s13  }
  0xf7   :  { %278 = dma.done.wait [#allocation5], 128  }
  0xf8   :  { %279 = vsyncadd [#allocation5], 4294967168 }
  0xf9   :  { %167 = vsyncpa [#allocation4], 1 }
  0xfa   :  { %168 = vsyncpa [#allocation7], 1 }
  0xfb   :  { %169 = vsyncpa [#allocation5], 1 }

</bundles_post_ra>
